<compile_context>
chip_gen: v5e
topology: v5e:2x2
jax: 0.10.0
libtpu: 0.0.40
codegen_flags: <defaults>
</compile_context>

<pallas_src>
import jax
import jax.numpy as jnp
from jax.experimental import pallas as pl
from jax.experimental.pallas import tpu as pltpu


def _round_up(x, m):
    return ((x + m - 1) // m) * m


# ------------------------------------------------------------------ fast path
def _gcn_small_kernel(adj_ref, feat_ref, wt_ref, b_ref, out_ref):
    a = adj_ref[...]                                          # (N, N) bf16 (0/1 exact)
    h1 = jnp.dot(a, feat_ref[...], preferred_element_type=jnp.float32)   # bf16 x bf16
    h2 = jnp.dot(a, h1.astype(jnp.bfloat16), preferred_element_type=jnp.float32)
    out_ref[...] = (jnp.dot(h2, wt_ref[...], preferred_element_type=jnp.float32)
                    + b_ref[...])                             # (N, F_out) + (1, F_out)


def _gcn_small(adj, feature, wt, bias2d):
    n, f_in = feature.shape
    f_out = wt.shape[1]
    bytes_est = (n * n * 2 + n * f_in * 2 + f_in * f_out * 4 + f_out * 4
                 + n * f_out * 4 + 3 * n * max(f_in, f_out) * 4)
    vmem_limit = int(min(max(2 * bytes_est, 32 << 20), 64 << 20))
    ce = pl.CostEstimate(
        flops=4 * n * n * f_in + 2 * n * f_in * f_out,
        transcendentals=0,
        bytes_accessed=n * n * 2 + n * f_in * 2 + f_in * f_out * 4 + n * f_out * 4,
    )
    return pl.pallas_call(
        _gcn_small_kernel,
        out_shape=jax.ShapeDtypeStruct((n, f_out), jnp.float32),
        in_specs=[
            pl.BlockSpec(memory_space=pltpu.MemorySpace.VMEM),  # adj (bf16)
            pl.BlockSpec(memory_space=pltpu.MemorySpace.VMEM),  # feature (bf16)
            pl.BlockSpec(memory_space=pltpu.MemorySpace.VMEM),  # W^T (f32)
            pl.BlockSpec(memory_space=pltpu.MemorySpace.VMEM),  # bias (1, F_out) f32
        ],
        out_specs=pl.BlockSpec(memory_space=pltpu.MemorySpace.VMEM),
        compiler_params=pltpu.CompilerParams(vmem_limit_bytes=vmem_limit),
        cost_estimate=ce,
    )(adj, feature, wt, bias2d)


# ----------------------------------------------------- tiled path (fused hops)
def _make_fused_kernel(tm, tk):
    """Fused kernel: phase 0 -> h1 = A @ h into VMEM scratch;
                     phase 1 -> out = (A @ h1) @ W^T + b."""

    def kernel(adj_ref, feat_ref, wt_ref, b_ref, out_ref, h1_ref, acc_ref):
        p = pl.program_id(0)           # 0: hop1, 1: hop2 + linear epilogue
        i = pl.program_id(1)           # row tile
        k = pl.program_id(2)           # reduction tile (last, "arbitrary")
        nk = pl.num_programs(2)

        @pl.when(k == 0)
        def _():
            acc_ref[...] = jnp.zeros_like(acc_ref)

        # Keep phase-0 writebacks of the (revisited) output block deterministic.
        @pl.when((p == 0) & (k == 0))
        def _():
            out_ref[...] = jnp.zeros_like(out_ref)

        a = adj_ref[...]                                   # (tm, tk) bf16, streamed
        koff = pl.multiple_of(k * tk, tk)

        @pl.when(p == 0)
        def _():
            x = feat_ref[pl.ds(koff, tk), :]               # resident bf16 feature panel
            acc_ref[...] += jnp.dot(a, x, preferred_element_type=jnp.float32)

        @pl.when(p == 1)
        def _():
            x = h1_ref[pl.ds(koff, tk), :]                 # h1 from VMEM scratch (bf16)
            acc_ref[...] += jnp.dot(a, x, preferred_element_type=jnp.float32)

        @pl.when((p == 0) & (k == nk - 1))
        def _():
            roff = pl.multiple_of(i * tm, tm)
            h1_ref[pl.ds(roff, tm), :] = acc_ref[...].astype(jnp.bfloat16)

        # Fused linear + bias epilogue: h2 never leaves VMEM.
        @pl.when((p == 1) & (k == nk - 1))
        def _():
            out_ref[...] = (
                jnp.dot(acc_ref[...], wt_ref[...], preferred_element_type=jnp.float32)
                + b_ref[...])

    return kernel


def _gcn_tiled(adj, feature, wt, bias2d, *, tm=512, tk=1024):
    assert tm % 128 == 0 and tk % 128 == 0 and tk % tm == 0, \
        "tm, tk must be multiples of 128 with tk a multiple of tm"
    n, f_in = feature.shape
    f_out = wt.shape[1]

    n_p = _round_up(n, tk)            # multiple of tk (and tm)
    f_in_p = _round_up(f_in, 128)     # lane-dense panels
    f_out_p = _round_up(f_out, 128)   # lane-dense output (sliced back below)

    # Zero padding is exact: padded adjacency rows/cols contribute nothing.
    # For a multi-layer GCN / training loop, pre-pad + bf16-cast A ONCE outside
    # the layer and reuse it -- this pad is an extra N^2 HBM round trip per call.
    if adj.shape == (n_p, n_p) and adj.dtype == jnp.bfloat16:
        adj_p = adj
    else:
        adj_p = jnp.zeros((n_p, n_p), jnp.bfloat16).at[:n, :n].set(adj)
    feat_p = jnp.zeros((n_p, f_in_p), jnp.bfloat16).at[:n, :f_in].set(feature)
    wt_p = jnp.zeros((f_in_p, f_out_p), jnp.float32).at[:f_in, :f_out].set(wt)
    b_p = jnp.zeros((1, f_out_p), jnp.float32).at[:, :f_out].set(bias2d)

    grid = (2, n_p // tm, n_p // tk)  # (phase, row tiles, reduction tiles)

    # VMEM budget (double-buffered inputs + resident scratch), clamped to 64 MiB
    # so the same config remains legal on v7x (64 MiB/TC) as well as v5e/v6e.
    est = (2 * tm * tk * 2            # A tiles (bf16, double buffered)
           + 2 * n_p * f_in_p * 2     # resident feature panel (bf16)
           + 2 * f_in_p * f_out_p * 4 # W^T
           + 2 * f_out_p * 4          # bias
           + 2 * tm * f_out_p * 4     # output block
           + n_p * f_in_p * 2         # h1 scratch (bf16)
           + tm * f_in_p * 4)         # f32 accumulator
    vmem_limit = int(min(max(est * 5 // 4, 32 << 20), 64 << 20))

    out_p = pl.pallas_call(
        _make_fused_kernel(tm, tk),
        out_shape=jax.ShapeDtypeStruct((n_p, f_out_p), jnp.float32),
        grid_spec=pltpu.PrefetchScalarGridSpec(
            num_scalar_prefetch=0,
            grid=grid,
            in_specs=[
                pl.BlockSpec((tm, tk), lambda p, i, k: (i, k)),           # A tile (bf16)
                pl.BlockSpec((n_p, f_in_p), lambda p, i, k: (0, 0)),      # feature panel (resident)
                pl.BlockSpec((f_in_p, f_out_p), lambda p, i, k: (0, 0)),  # W^T (resident)
                pl.BlockSpec((1, f_out_p), lambda p, i, k: (0, 0)),       # bias (resident)
            ],
            out_specs=pl.BlockSpec((tm, f_out_p), lambda p, i, k: (i, 0)),
            scratch_shapes=[
                pltpu.VMEM((n_p, f_in_p), jnp.bfloat16),   # h1 (persists across phases)
                pltpu.VMEM((tm, f_in_p), jnp.float32),     # per-row-tile f32 accumulator
            ],
        ),
        compiler_params=pltpu.CompilerParams(
            # h1 lives in per-core VMEM scratch shared across phases -> grid must
            # run sequentially on one core (no megacore row-sharding here).
            dimension_semantics=("arbitrary", "arbitrary", "arbitrary"),
            vmem_limit_bytes=vmem_limit,
        ),
        cost_estimate=pl.CostEstimate(
            flops=4 * n_p * n_p * f_in_p + 2 * n_p * f_in_p * f_out_p,
            transcendentals=0,
            bytes_accessed=(2 * n_p * n_p * 2          # A streamed twice (bf16)
                            + n_p * f_in_p * 2         # feature panel once
                            + f_in_p * f_out_p * 4
                            + n_p * f_out_p * 4),      # output
        ),
    )(adj_p, feat_p, wt_p, b_p)

    return out_p[:n, :f_out]


# -------------------------------------------------------------- public wrapper
def gcn_layer(adj, feature, weight, bias, *, force_tiled=False, tm=512, tk=1024,
              small_threshold=2048):
    """adj: (N, N), feature: (N, F_in), weight: (F_out, F_in) [nn.Linear], bias: (F_out,)."""
    n, _ = feature.shape
    f_out = weight.shape[0]
    # 0/1 adjacency is exact in bf16; features feed the MXU in bf16 (f32 accumulation).
    adj = adj.astype(jnp.bfloat16)
    feature = feature.astype(jnp.bfloat16)
    wt = weight.astype(jnp.float32).T        # pre-transpose once outside the kernel
    bias2d = bias.reshape(1, f_out).astype(jnp.float32)

    if not force_tiled and n <= small_threshold:
        return _gcn_small(adj, feature, wt, bias2d)
    return _gcn_tiled(adj, feature, wt, bias2d, tm=tm, tk=tk)


if __name__ == "__main__":
    # Small, deterministic synthetic graph + parameters (matches the module).
    N, F_IN, F_OUT = 16, 8, 32

    key = jax.random.PRNGKey(0)
    k_adj, k_feat, k_w, k_b = jax.random.split(key, 4)

    # Random directed graph as a dense in-adjacency matrix (A[v,u]=1 iff u->v).
    adj = jax.random.bernoulli(k_adj, p=0.3, shape=(N, N)).astype(jnp.float32)
    feature = jax.random.normal(k_feat, (N, F_IN), dtype=jnp.float32)

    # nn.Linear(in_feats, out_feats) params: W (F_OUT, F_IN), b (F_OUT,).
    bound = 1.0 / (F_IN ** 0.5)
    weight = jax.random.uniform(k_w, (F_OUT, F_IN), jnp.float32, -bound, bound)
    bias = jax.random.uniform(k_b, (F_OUT,), jnp.float32, -bound, bound)

    # --- fast (single-block) path at the module's toy size ---
    out = jax.block_until_ready(gcn_layer(adj, feature, weight, bias))
    ref = (adj @ (adj @ feature)) @ weight.T + bias
    assert out.shape == (N, F_OUT)
    rel1 = float(jnp.max(jnp.abs(out - ref)) / (jnp.max(jnp.abs(ref)) + 1e-6))
    assert rel1 < 5e-2, rel1   # bf16 feature/h1 feed -> ~0.5-1% rounding vs f32 ref

    # --- fused tiled/streaming path (forced) on a modest non-divisible graph ---
    N2 = 300
    k2_adj, k2_feat = jax.random.split(jax.random.PRNGKey(1), 2)
    adj2 = jax.random.bernoulli(k2_adj, p=0.05, shape=(N2, N2)).astype(jnp.float32)
    feat2 = jax.random.normal(k2_feat, (N2, F_IN), dtype=jnp.float32)
    out2 = jax.block_until_ready(
        gcn_layer(adj2, feat2, weight, bias, force_tiled=True, tm=128, tk=256))
    ref2 = (adj2 @ (adj2 @ feat2)) @ weight.T + bias
    assert out2.shape == (N2, F_OUT)
    rel2 = float(jnp.max(jnp.abs(out2 - ref2)) / (jnp.max(jnp.abs(ref2)) + 1e-6))
    assert rel2 < 5e-2, rel2

    print("KERNEL_OK")
</pallas_src>

<mosaic_0001>
module attributes {stable_mosaic.version = 11 : i64} {
  func.func @_gcn_small_kernel(%arg0: memref<16x16xbf16, #tpu.memory_space<vmem>>, %arg1: memref<16x8xbf16, #tpu.memory_space<vmem>>, %arg2: memref<8x32xf32, #tpu.memory_space<vmem>>, %arg3: memref<1x32xf32, #tpu.memory_space<vmem>>, %arg4: memref<16x32xf32, #tpu.memory_space<vmem>>) attributes {dimension_semantics = [], scalar_prefetch = 0 : i64, scratch_operands = 0 : i64, tpu.core_type = #tpu.core_type<tc>} {
    %c0 = arith.constant 0 : index
    %c0_0 = arith.constant 0 : index
    %0 = vector.load %arg0[%c0, %c0_0] : memref<16x16xbf16, #tpu.memory_space<vmem>>, vector<16x16xbf16>
    %c0_1 = arith.constant 0 : index
    %c0_2 = arith.constant 0 : index
    %1 = vector.load %arg1[%c0_1, %c0_2] : memref<16x8xbf16, #tpu.memory_space<vmem>>, vector<16x8xbf16>
    %cst = arith.constant dense<0.000000e+00> : vector<16x8xf32>
    %2 = tpu.matmul %0, %1, %cst {dimension_numbers = #tpu.dot_dimension_numbers<[1], [0], [0], [1], [0, 0, 1, 1], [], []>} : vector<16x16xbf16>, vector<16x8xbf16>, vector<16x8xf32> -> vector<16x8xf32>
    %3 = arith.truncf %2 : vector<16x8xf32> to vector<16x8xbf16>
    %cst_3 = arith.constant dense<0.000000e+00> : vector<16x8xf32>
    %4 = tpu.matmul %0, %3, %cst_3 {dimension_numbers = #tpu.dot_dimension_numbers<[1], [0], [0], [1], [0, 0, 1, 1], [], []>} : vector<16x16xbf16>, vector<16x8xbf16>, vector<16x8xf32> -> vector<16x8xf32>
    %c0_4 = arith.constant 0 : index
    %c0_5 = arith.constant 0 : index
    %5 = vector.load %arg2[%c0_4, %c0_5] : memref<8x32xf32, #tpu.memory_space<vmem>>, vector<8x32xf32>
    %cst_6 = arith.constant dense<0.000000e+00> : vector<16x32xf32>
    %6 = tpu.matmul %4, %5, %cst_6 {dimension_numbers = #tpu.dot_dimension_numbers<[1], [0], [0], [1], [0, 0, 1, 1], [], []>} : vector<16x8xf32>, vector<8x32xf32>, vector<16x32xf32> -> vector<16x32xf32>
    %c0_7 = arith.constant 0 : index
    %c0_8 = arith.constant 0 : index
    %7 = vector.load %arg3[%c0_7, %c0_8] : memref<1x32xf32, #tpu.memory_space<vmem>>, vector<1x32xf32>
    %8 = vector.broadcast %7 : vector<1x32xf32> to vector<16x32xf32>
    %9 = arith.addf %6, %8 : vector<16x32xf32>
    %c0_9 = arith.constant 0 : index
    %c0_10 = arith.constant 0 : index
    %10 = vector.load %arg4[%c0_9, %c0_10] : memref<16x32xf32, #tpu.memory_space<vmem>>, vector<16x32xf32>
    tpu.vector_store %arg4[%c0_9, %c0_10], %9 {strides = array<i32>} : memref<16x32xf32, #tpu.memory_space<vmem>>, vector<16x32xf32>,
    return
  }
}

</mosaic_0001>

<bundles_post_ra>
// kernel: tpu_custom_call.1
= control target key start
LH: loop header
LB: loop body
LE: loop exit
PB: predicated region body
PF: predicated region fallthrough
CT: control target
= control target key end

     0   :  { %9 = vsyncpa [#allocation3], 0  ;;  %s253_s0 = inlined_call_operand.vmem [shape: bf16[16,16], index: 0, kind: input, shape index: {}]   ;;  %s254_s1 = inlined_call_operand.vmem [shape: bf16[16,8], index: 1, kind: input, shape index: {}]   ;;  %s255_s2 = inlined_call_operand.hbm [shape: f32[8,32], index: 2, kind: input, shape index: {}]   ;;  %s256_s3 = inlined_call_operand.vmem [shape: f32[1,32], index: 3, kind: input, shape index: {}]   ;;  %s257_s4 = inlined_call_operand.hbm [shape: f32[16,32], index: 4, kind: output, shape index: {}]  }
   0x1   :  { %10 = vsyncpa [#allocation4], 0  ;;  %s20_s17 = sshll.u32 %s255_s2, 4  ;;  %s209_s18 = smov [#allocation2]   ;;  %s21_s17 = int_to_ptr.hbm [resolvable:$true] %s20_s17 }
   0x2   :  { %s22_s19 = sshll.u32 %s209_s18, 4  ;;  %s23_s19 = int_to_ptr.vmem [resolvable:$true] %s22_s19 }
   0x3   :  { %25 = dma.hbm_to_vmem [thread:$0]  %s21_s17, 128, %s23_s19, [#allocation3]  }
   0x4   :  { %205 = dma.done.wait [#allocation3], 128  }
   0x5   :  { %206 = vsyncadd [#allocation3], 4294967168  ;;  %v151_v0 = vld [vmem:[%s254_s1] sm:$0xff]  ;;  %vm48_vm0 = vcmask 130048   ;;  %vm86_vm1 = vcmask 64512   ;;  %vm116_vm2 = vcmask 261120  }
   0x6   :  { %v150_v1 = vld [vmem:[%s253_s0] sm:$0xff]  ;;  %59 = vmatpush.bf16.msra.mxu0 %v151_v0  ;;  %s210_s0 = smov [#allocation5]   ;;  %s125_s27 = sshll.u32 %s257_s4, 4  ;;  %s126_s27 = int_to_ptr.hbm [resolvable:$true] %s125_s27 }
   0x7   :  { %v81_v5 = vld [vmem:[#allocation2] sm:$0xff]  ;;  %s123_s24 = sshll.u32 %s210_s0, 4  ;;  %s211_s28 = smov 128   ;;  %s124_s24 = int_to_ptr.vmem [resolvable:$true] %s123_s24 }
   0x8   :  { %108 = vmatpush.msra.mxu2 %v81_v5  ;;  %v156_v8 = vld [vmem:[%s256_s3] ss:$0 sm:$0xff]  ;;  %s212_s29 = smov 8  }
   0x9   :  { %146 = vmatmul.msk.bf16.vlgmr.msra.gmra.mxu0 %vm48_vm0, %v150_v1 }
  0x86   :  { %v61_v2 = vpop.f32.mrf.mxu0 }
  0x8e   :  { %v63_v3 = vpop.f32.mrf.mxu0 }
  0x8f   :  { %v66_v4 = vpack.c.bf16 %v63_v3, %v61_v2 }
  0x91   :  { %74 = vmatpush.bf16.msra.mxu1 %v66_v4 }
  0x94   :  { %147 = vmatmul.msk.bf16.vlgmr.msra.gmra.mxu1 %vm48_vm0, %v150_v1 }
 0x111   :  { %v76_v6 = vpop.f32.mrf.mxu1 }
 0x112   :  { %148 = vmatmul.msk.f32.vlgmr.msra.gmra.mxu2 %vm86_vm1, %v76_v6 }
 0x119   :  { %v78_v7 = vpop.f32.mrf.mxu1 }
 0x11a   :  { %149 = vmatmul.msk.f32.gmra.mxu2 %vm86_vm1, %v78_v7 }
 0x195   :  { %v110_v9 = vpop.f32.mrf.mxu2 }
 0x196   :  { %v111_v10 = vadd.f32 %v156_v8, %v110_v9 }
 0x198   :  { %117 = vst.msk [vmem:[#allocation5] sm:$0xff] %vm116_vm2, %v111_v10 }
 0x19d   :  { %v113_v11 = vpop.f32.mrf.mxu2 }
 0x19e   :  { %v114_v12 = vadd.f32 %v156_v8, %v113_v11 }
 0x1a0   :  { %118 = vst.msk [vmem:[#allocation5 + $0x8] sm:$0xff] %vm116_vm2, %v114_v12 }
 0x1a1   :  { %131 = dma.vmem_to_hbm [thread:$0]  %s124_s24, 256, %s126_s27, [#allocation4], %s211_s28, %s211_s28, %s212_s29  }
 0x1a2   :  { %207 = dma.done.wait [#allocation4], 256  }
 0x1a3   :  { %208 = vsyncadd [#allocation4], 4294967040 }
 0x1a4   :  { %136 = vsyncpa [#allocation3], 1 }
 0x1a5   :  { %137 = vsyncpa [#allocation4], 1 }

</bundles_post_ra>
